<compile_context>
chip_gen: v6e
topology: v6e:2x2x1
jax: 0.10.0
libtpu: 0.0.40
codegen_flags: <defaults>
</compile_context>

<pallas_src>
import functools

import jax
import jax.numpy as jnp
from jax.experimental import pallas as pl
from jax.experimental.pallas import tpu as pltpu

THRESHOLD = 0.2                 # BerHuLoss(threshold=0.2) default from __init__
LANE = 128
SUBLANE = 8
TARGET_WINDOW_BYTES = 1 << 20   # ~1 MiB per input stream per pipeline buffer
MAX_ROWS_PER_BLOCK = 4096
MIN_ROWS_PER_BLOCK = 512
# TODO(synk): sweep TARGET_WINDOW_BYTES per generation (v5e ~2048 rows,
# v6e/v7x ~4096 rows for f32) once per-chip profiling is available.


def _detect_num_tensorcores():
    """Best-effort TensorCore count (2 on v7x, 1 on v5e/v6e)."""
    # TODO(synk): verify on v7x that a leading "parallel" grid axis really
    # shards across both TensorCores; if not, switch to pltpu.CORE_PARALLEL.
    try:
        info = pltpu.get_tpu_info()
    except Exception:
        return 1
    for name in ("num_cores", "core_count", "num_tensorcores", "tensorcore_count"):
        v = getattr(info, name, None)
        if isinstance(v, int) and 1 <= v <= 8:
            return v
    return 1


_NUM_CORES = _detect_num_tensorcores()


def _choose_rows_per_block(itemsize):
    rows = TARGET_WINDOW_BYTES // (LANE * max(int(itemsize), 1))
    rows = max(MIN_ROWS_PER_BLOCK, min(MAX_ROWS_PER_BLOCK, rows))
    return (rows // SUBLANE) * SUBLANE


def _rowsum8(x):
    """(R, 128) -> (8, 128) partial sums via pure vreg adds (R % 8 == 0)."""
    r = x.shape[0]
    return jnp.sum(x.reshape(r // SUBLANE, SUBLANE, LANE), axis=0)


def _rowmax8(x):
    """(R, 128) -> (8, 128) partial maxes via pure vreg maxes (R % 8 == 0)."""
    r = x.shape[0]
    return jnp.max(x.reshape(r // SUBLANE, SUBLANE, LANE), axis=0)


# ----------------------------- pass 1: global max -----------------------------
def _max_kernel(num_blocks, grid_blocks, last_rows, has_mask, *refs):
    """Per-core (8,128) running max of |pred - target| over valid elements."""
    if has_mask:
        p_ref, t_ref, m_ref, mx_ref = refs
    else:
        p_ref, t_ref, mx_ref = refs
        m_ref = None

    @pl.when(pl.program_id(1) == 0)
    def _init():
        mx_ref[...] = jnp.full(mx_ref.shape, -jnp.inf, dtype=mx_ref.dtype)

    rpb = p_ref.shape[0]
    ragged = last_rows < rpb              # static: last block has a garbage tail
    has_dupes = grid_blocks > num_blocks  # static: clamped duplicate blocks exist

    def accumulate(apply_row_mask):
        d = jnp.abs(p_ref[...].astype(jnp.float32) - t_ref[...].astype(jnp.float32))
        if has_mask:
            d = jnp.where(m_ref[...] != 0, d, -jnp.inf)
        if apply_row_mask:
            rows = jax.lax.broadcasted_iota(jnp.int32, d.shape, 0)
            d = jnp.where(rows < last_rows, d, -jnp.inf)
        mx_ref[...] = jnp.maximum(mx_ref[...], _rowmax8(d))

    if not ragged and not has_dupes:
        accumulate(False)                 # hot path: no per-step masking at all
    else:
        blk = pl.program_id(0) * pl.num_programs(1) + pl.program_id(1)
        full_limit = num_blocks - 1 if ragged else num_blocks

        @pl.when(blk < full_limit)
        def _full():
            accumulate(False)

        if ragged:
            @pl.when(blk == num_blocks - 1)
            def _last():
                accumulate(True)
        # blk >= num_blocks (clamped duplicates): contribute nothing.


# --------------------------- pass 2: region partials ---------------------------
def _sums_kernel(num_blocks, grid_blocks, last_rows, has_mask, *refs):
    """Per-core (8,128) partial sums/counts for the L1 / L2 regions."""
    if has_mask:
        c_ref, p_ref, t_ref, m_ref, s1_ref, n1_ref, sd2_ref, n2_ref = refs
    else:
        c_ref, p_ref, t_ref, s1_ref, n1_ref, sd2_ref = refs
        m_ref = n2_ref = None

    @pl.when(pl.program_id(1) == 0)
    def _init():
        s1_ref[...] = jnp.zeros(s1_ref.shape, s1_ref.dtype)
        n1_ref[...] = jnp.zeros(n1_ref.shape, n1_ref.dtype)
        sd2_ref[...] = jnp.zeros(sd2_ref.shape, sd2_ref.dtype)
        if has_mask:
            n2_ref[...] = jnp.zeros(n2_ref.shape, n2_ref.dtype)

    rpb = p_ref.shape[0]
    ragged = last_rows < rpb
    has_dupes = grid_blocks > num_blocks
    c = c_ref[0]

    def accumulate(apply_row_mask):
        d = jnp.abs(p_ref[...].astype(jnp.float32) - t_ref[...].astype(jnp.float32))
        if has_mask:
            valid = m_ref[...] != 0
            if apply_row_mask:
                rows = jax.lax.broadcasted_iota(jnp.int32, d.shape, 0)
                valid = jnp.logical_and(valid, rows < last_rows)
            gt = d > c
            is_l2 = jnp.logical_and(valid, gt)
            is_l1 = jnp.logical_and(valid, jnp.logical_not(gt))
            s1_ref[...] += _rowsum8(jnp.where(is_l1, d, 0.0))
            n1_ref[...] += _rowsum8(jnp.where(is_l1, 1.0, 0.0))
            sd2_ref[...] += _rowsum8(jnp.where(is_l2, d * d, 0.0))
            n2_ref[...] += _rowsum8(jnp.where(is_l2, 1.0, 0.0))
        else:
            if apply_row_mask:
                # Garbage rows of the last (partial) block: force d = 0 so they
                # fall in the L1 bucket with zero sum, and mask their count.
                rows_ok = jax.lax.broadcasted_iota(jnp.int32, d.shape, 0) < last_rows
                d = jnp.where(rows_ok, d, 0.0)
                is_l2 = d > c                    # c >= 0, so d == 0 is never L2
                n1_blk = jnp.where(
                    jnp.logical_and(rows_ok, jnp.logical_not(is_l2)), 1.0, 0.0)
            else:
                is_l2 = d > c
                n1_blk = jnp.where(is_l2, 0.0, 1.0)
            s1_ref[...] += _rowsum8(jnp.where(is_l2, 0.0, d))
            n1_ref[...] += _rowsum8(n1_blk)
            sd2_ref[...] += _rowsum8(jnp.where(is_l2, d * d, 0.0))

    if not ragged and not has_dupes:
        accumulate(False)
    else:
        blk = pl.program_id(0) * pl.num_programs(1) + pl.program_id(1)
        full_limit = num_blocks - 1 if ragged else num_blocks

        @pl.when(blk < full_limit)
        def _full():
            accumulate(False)

        if ragged:
            @pl.when(blk == num_blocks - 1)
            def _last():
                accumulate(True)


# --------------------------------- wrapper ---------------------------------
@functools.partial(jax.jit, static_argnames=("threshold", "has_mask"))
def _berhu_loss_impl(pred, target, mask, threshold, has_mask):
    out_dtype = pred.dtype
    p = pred.reshape(-1)
    t = target.reshape(-1)
    n = p.shape[0]
    m_flat = mask.reshape(-1) if has_mask else None

    # Kernels consume the (8*128)-aligned prefix as a (rows, 128) lane-major
    # slab (free reshape when n is aligned); the < 1024-element tail is
    # handled with trivial jnp glue below -- no jnp.pad HBM copy, ever.
    chunk = SUBLANE * LANE
    n_main = (n // chunk) * chunk
    rows_main = n_main // LANE
    run_kernel = n_main > 0
    have_tail = n_main < n

    def _prefix(x):
        x = x if n_main == n else x[:n_main]
        return x.reshape(rows_main, LANE)

    # ---- tail pieces (plain jnp, < 1024 elements, negligible) ---------------
    if have_tail:
        d_tail = jnp.abs(p[n_main:].astype(jnp.float32)
                         - t[n_main:].astype(jnp.float32))
        if has_mask:
            mt = m_flat[n_main:]
            tail_ok = mt if mt.dtype == jnp.bool_ else (mt > 0.5)
        else:
            tail_ok = jnp.ones(d_tail.shape, jnp.bool_)
        tail_max = jnp.max(jnp.where(tail_ok, d_tail, -jnp.inf))

    if run_kernel:
        operands = [_prefix(p), _prefix(t)]
        if has_mask:
            mi = (m_flat.astype(jnp.int8) if m_flat.dtype == jnp.bool_
                  else (m_flat > 0.5).astype(jnp.int8))
            operands.append(_prefix(mi))

        rpb = min(_choose_rows_per_block(p.dtype.itemsize), rows_main)
        num_blocks = pl.cdiv(rows_main, rpb)
        last_rows = rows_main - (num_blocks - 1) * rpb
        ncores = _NUM_CORES if num_blocks >= _NUM_CORES else 1
        bpc = pl.cdiv(num_blocks, ncores)        # blocks per core
        grid = (ncores, bpc)
        grid_blocks = ncores * bpc

        def data_map(ci, i):
            blk = ci * bpc + i
            if grid_blocks > num_blocks:
                # Clamped duplicate blocks issue an in-bounds DMA but the
                # kernel skips their accumulation entirely.
                blk = jnp.minimum(blk, num_blocks - 1)
            return (blk, 0)

        data_spec = pl.BlockSpec((rpb, LANE), data_map)
        in_specs = [data_spec] * len(operands)
        acc_spec = pl.BlockSpec((SUBLANE, LANE), lambda ci, i: (ci, 0))
        acc_shape = jax.ShapeDtypeStruct((ncores * SUBLANE, LANE), jnp.float32)

        # Explicit VMEM budget: double-buffered input windows + headroom for
        # Mosaic's materialized f32 elementwise temporaries + fixed slack.
        win_bytes = rpb * LANE * sum(int(op.dtype.itemsize) for op in operands)
        vmem_limit = int(2 * win_bytes + 10 * rpb * LANE * 4 + (4 << 20))
        vmem_limit = max(32 << 20, min(vmem_limit, 56 << 20))
        cparams = pltpu.CompilerParams(
            dimension_semantics=("parallel", "arbitrary"),
            vmem_limit_bytes=vmem_limit)

        stream_bytes = n_main * sum(int(op.dtype.itemsize) for op in operands)
        acc_bytes = ncores * SUBLANE * LANE * 4

        # ---- pass 1: masked global max of |pred - target| -------------------
        mx = pl.pallas_call(
            functools.partial(_max_kernel, num_blocks, grid_blocks, last_rows,
                              has_mask),
            grid=grid,
            in_specs=in_specs,
            out_specs=acc_spec,
            out_shape=acc_shape,
            compiler_params=cparams,
            cost_estimate=pl.CostEstimate(
                flops=3 * n_main, transcendentals=0,
                bytes_accessed=stream_bytes + acc_bytes),
        )(*operands)
        max_val = jnp.max(mx)
    else:
        max_val = jnp.asarray(-jnp.inf, jnp.float32)

    if have_tail:
        max_val = jnp.maximum(max_val, tail_max)

    # c = threshold * diff.max(); if no valid pixels, max is -inf -> force c = 0
    c = jnp.where(jnp.isfinite(max_val), threshold * max_val, 0.0)

    # ---- pass 2: per-region partial sums / counts ----------------------------
    if run_kernel:
        c_arr = jnp.reshape(c, (1,)).astype(jnp.float32)
        n_outs = 4 if has_mask else 3
        outs = pl.pallas_call(
            functools.partial(_sums_kernel, num_blocks, grid_blocks, last_rows,
                              has_mask),
            grid=grid,
            in_specs=[pl.BlockSpec(memory_space=pltpu.MemorySpace.SMEM)] + in_specs,
            out_specs=(acc_spec,) * n_outs,
            out_shape=(acc_shape,) * n_outs,
            compiler_params=cparams,
            cost_estimate=pl.CostEstimate(
                flops=8 * n_main, transcendentals=0,
                bytes_accessed=stream_bytes + n_outs * acc_bytes),
        )(c_arr, *operands)
        s1 = jnp.sum(outs[0])
        n1 = jnp.sum(outs[1])
        sd2 = jnp.sum(outs[2])
        if has_mask:
            n2 = jnp.sum(outs[3])
        else:
            n2 = jnp.float32(n_main) - n1   # kernel covers exactly n_main elems
    else:
        s1 = n1 = sd2 = n2 = jnp.float32(0.0)

    if have_tail:
        gt_t = d_tail > c
        is_l2_t = jnp.logical_and(tail_ok, gt_t)
        is_l1_t = jnp.logical_and(tail_ok, jnp.logical_not(gt_t))
        s1 = s1 + jnp.sum(jnp.where(is_l1_t, d_tail, 0.0))
        n1 = n1 + jnp.sum(is_l1_t.astype(jnp.float32))
        sd2 = sd2 + jnp.sum(jnp.where(is_l2_t, d_tail * d_tail, 0.0))
        n2 = n2 + jnp.sum(is_l2_t.astype(jnp.float32))

    # TODO(synk): final scalar combine (means, L2 closed form) is plain-JAX
    # glue by design; it is O(1) work and not worth a kernel.
    safe_c = jnp.where(c > 0.0, c, 1.0)              # guard div-by-zero
    s2 = (sd2 + n2 * c * c) * (0.5 / safe_c)         # sum over L2 of (d^2+c^2)/(2c)
    loss_l1 = jnp.where(n1 > 0, s1 / jnp.maximum(n1, 1.0), 0.0)
    loss_l2 = jnp.where(n2 > 0, s2 / jnp.maximum(n2, 1.0), 0.0)
    # if no valid pixels at all, both counts are 0 -> total is 0 (matches torch)
    return (loss_l1 + loss_l2).astype(out_dtype)


def berhu_loss(pred, target, mask=None, threshold=THRESHOLD):
    if pred.shape != target.shape:
        raise ValueError(f"Shape mismatch: pred {pred.shape}, target {target.shape}")
    if threshold <= 0:
        raise ValueError("Threshold must be a positive float")
    if mask is not None and mask.shape != pred.shape:
        raise ValueError(f"Mask shape must match prediction shape: mask {mask.shape}")
    if pred.size == 0:
        return jnp.asarray(0.0, pred.dtype)
    if mask is None:
        dummy = jnp.zeros((1,), jnp.float32)
        return _berhu_loss_impl(pred, target, dummy, threshold, False)
    return _berhu_loss_impl(pred, target, mask, threshold, True)


def berhu_ref(pred, target, mask=None, threshold=THRESHOLD):
    """Pure-JAX reference matching the PyTorch semantics."""
    diff = jnp.abs(pred.astype(jnp.float32) - target.astype(jnp.float32)).reshape(-1)
    if mask is not None:
        m = mask.reshape(-1) > 0.5
    else:
        m = jnp.ones_like(diff, dtype=bool)
    c = threshold * jnp.max(jnp.where(m, diff, -jnp.inf))
    l1m = m & (diff <= c)
    l2m = m & (diff > c)
    n1 = jnp.sum(l1m.astype(jnp.float32))
    n2 = jnp.sum(l2m.astype(jnp.float32))
    s1 = jnp.sum(jnp.where(l1m, diff, 0.0))
    safe_c = jnp.where(c > 0, c, 1.0)
    l2v = (diff * diff + c * c) / (2.0 * safe_c)
    s2 = jnp.sum(jnp.where(l2m, l2v, 0.0))
    loss1 = jnp.where(n1 > 0, s1 / jnp.maximum(n1, 1.0), 0.0)
    loss2 = jnp.where(n2 > 0, s2 / jnp.maximum(n2, 1.0), 0.0)
    return loss1 + loss2


if __name__ == "__main__":
    key = jax.random.PRNGKey(0)
    k1, k2, k3 = jax.random.split(key, 3)

    # Primary NCHW test shape implied by the module (batch=2, channels=4, 16x16).
    shape = (2, 4, 16, 16)
    pred = jax.random.normal(k1, shape, jnp.float32)
    target = jax.random.normal(k2, shape, jnp.float32)
    mask = jax.random.uniform(k3, shape) > 0.3          # boolean mask

    out = berhu_loss(pred, target)
    out_masked = berhu_loss(pred, target, mask)
    jax.block_until_ready((out, out_masked))

    ref = berhu_ref(pred, target)
    ref_masked = berhu_ref(pred, target, mask)
    assert jnp.allclose(out, ref, rtol=1e-5, atol=1e-6), (out, ref)
    assert jnp.allclose(out_masked, ref_masked, rtol=1e-5, atol=1e-6), (out_masked, ref_masked)

    # Secondary shape: exercises the ragged last block and the <1024-elem tail.
    shape2 = (1, 3, 320, 317)                            # 304,320 elems (unaligned)
    p2 = jax.random.normal(k1, shape2, jnp.float32)
    t2 = jax.random.normal(k2, shape2, jnp.float32)
    m2 = jax.random.uniform(k3, shape2) > 0.5
    o2 = berhu_loss(p2, t2)
    o2m = berhu_loss(p2, t2, m2)
    jax.block_until_ready((o2, o2m))
    assert jnp.allclose(o2, berhu_ref(p2, t2), rtol=1e-5, atol=1e-6)
    assert jnp.allclose(o2m, berhu_ref(p2, t2, m2), rtol=1e-5, atol=1e-6)

    print("KERNEL_OK")
</pallas_src>

<mosaic_0001>
module attributes {stable_mosaic.version = 11 : i64} {
  func.func @_max_kernel(%arg0: i32, %arg1: i32, %arg2: memref<16x128xf32, #tpu.memory_space<vmem>>, %arg3: memref<16x128xf32, #tpu.memory_space<vmem>>, %arg4: memref<8x128xf32, #tpu.memory_space<vmem>>) attributes {dimension_semantics = [#tpu.dimension_semantics<parallel>, #tpu.dimension_semantics<arbitrary>], iteration_bounds = array<i64: 1, 1>, scalar_prefetch = 0 : i64, scratch_operands = 0 : i64, tpu.core_type = #tpu.core_type<tc>, window_params = [{transform_indices = @transform_0, window_bounds = array<i64: 16, 128>}, {transform_indices = @transform_1, window_bounds = array<i64: 16, 128>}, {transform_indices = @transform_2, window_bounds = array<i64: 8, 128>}]} {
    %c0_i32 = arith.constant 0 : i32
    %0 = arith.cmpi eq, %arg1, %c0_i32 : i32
    %1 = arith.extui %0 : i1 to i32
    %c0_i32_0 = arith.constant 0 : i32
    %2 = arith.cmpi ne, %1, %c0_i32_0 : i32
    scf.if %2 {
      %cst_8 = arith.constant 0xFF800000 : f32
      %12 = vector.broadcast %cst_8 : f32 to vector<8x128xf32>
      %c0_9 = arith.constant 0 : index
      %c0_10 = arith.constant 0 : index
      %13 = vector.load %arg4[%c0_9, %c0_10] : memref<8x128xf32, #tpu.memory_space<vmem>>, vector<8x128xf32>
      tpu.vector_store %arg4[%c0_9, %c0_10], %12 {strides = array<i32>} : memref<8x128xf32, #tpu.memory_space<vmem>>, vector<8x128xf32>,
    } else {
    }
    %c0 = arith.constant 0 : index
    %c0_1 = arith.constant 0 : index
    %3 = vector.load %arg2[%c0, %c0_1] : memref<16x128xf32, #tpu.memory_space<vmem>>, vector<16x128xf32>
    %c0_2 = arith.constant 0 : index
    %c0_3 = arith.constant 0 : index
    %4 = vector.load %arg3[%c0_2, %c0_3] : memref<16x128xf32, #tpu.memory_space<vmem>>, vector<16x128xf32>
    %5 = arith.subf %3, %4 : vector<16x128xf32>
    %6 = math.absf %5 : vector<16x128xf32>
    %c0_4 = arith.constant 0 : index
    %c0_5 = arith.constant 0 : index
    %7 = vector.load %arg4[%c0_4, %c0_5] : memref<8x128xf32, #tpu.memory_space<vmem>>, vector<8x128xf32>
    %8 = vector.shape_cast %6 : vector<16x128xf32> to vector<2x8x128xf32>
    %cst = arith.constant dense<0xFF800000> : vector<8x128xf32>
    %9 = vector.multi_reduction <maximumf>, %8, %cst [0] : vector<2x8x128xf32> to vector<8x128xf32>
    %10 = arith.maximumf %7, %9 : vector<8x128xf32>
    %c0_6 = arith.constant 0 : index
    %c0_7 = arith.constant 0 : index
    %11 = vector.load %arg4[%c0_6, %c0_7] : memref<8x128xf32, #tpu.memory_space<vmem>>, vector<8x128xf32>
    tpu.vector_store %arg4[%c0_6, %c0_7], %10 {strides = array<i32>} : memref<8x128xf32, #tpu.memory_space<vmem>>, vector<8x128xf32>,
    return
  }
  func.func @transform_0(%arg0: i32, %arg1: i32) -> (i32, i32) {
    %c1_i32 = arith.constant 1 : i32
    %0 = arith.muli %arg0, %c1_i32 : i32
    %1 = arith.addi %0, %arg1 : i32
    %c0_i32 = arith.constant 0 : i32
    %c0_i32_0 = arith.constant 0 : i32
    return %1, %c0_i32 : i32, i32
  }
  func.func @transform_1(%arg0: i32, %arg1: i32) -> (i32, i32) {
    %c1_i32 = arith.constant 1 : i32
    %0 = arith.muli %arg0, %c1_i32 : i32
    %1 = arith.addi %0, %arg1 : i32
    %c0_i32 = arith.constant 0 : i32
    %c0_i32_0 = arith.constant 0 : i32
    return %1, %c0_i32 : i32, i32
  }
  func.func @transform_2(%arg0: i32, %arg1: i32) -> (i32, i32) {
    %c0_i32 = arith.constant 0 : i32
    %c0_i32_0 = arith.constant 0 : i32
    return %arg0, %c0_i32 : i32, i32
  }
}

module attributes {stable_mosaic.version = 11 : i64} {
  func.func @_sums_kernel(%arg0: i32, %arg1: i32, %arg2: memref<1xf32, #tpu.memory_space<smem>>, %arg3: memref<16x128xf32, #tpu.memory_space<vmem>>, %arg4: memref<16x128xf32, #tpu.memory_space<vmem>>, %arg5: memref<8x128xf32, #tpu.memory_space<vmem>>, %arg6: memref<8x128xf32, #tpu.memory_space<vmem>>, %arg7: memref<8x128xf32, #tpu.memory_space<vmem>>) attributes {dimension_semantics = [#tpu.dimension_semantics<parallel>, #tpu.dimension_semantics<arbitrary>], iteration_bounds = array<i64: 1, 1>, scalar_prefetch = 0 : i64, scratch_operands = 0 : i64, tpu.core_type = #tpu.core_type<tc>, window_params = [{transform_indices = @transform_0, window_bounds = array<i64: 1>}, {transform_indices = @transform_1, window_bounds = array<i64: 16, 128>}, {transform_indices = @transform_2, window_bounds = array<i64: 16, 128>}, {transform_indices = @transform_3, window_bounds = array<i64: 8, 128>}, {transform_indices = @transform_4, window_bounds = array<i64: 8, 128>}, {transform_indices = @transform_5, window_bounds = array<i64: 8, 128>}]} {
    %c0_i32 = arith.constant 0 : i32
    %0 = arith.cmpi eq, %arg1, %c0_i32 : i32
    %1 = arith.extui %0 : i1 to i32
    %c0_i32_0 = arith.constant 0 : i32
    %2 = arith.cmpi ne, %1, %c0_i32_0 : i32
    scf.if %2 {
      %cst_23 = arith.constant 0.000000e+00 : f32
      %33 = vector.broadcast %cst_23 : f32 to vector<8x128xf32>
      %c0_24 = arith.constant 0 : index
      %c0_25 = arith.constant 0 : index
      %34 = vector.load %arg5[%c0_24, %c0_25] : memref<8x128xf32, #tpu.memory_space<vmem>>, vector<8x128xf32>
      tpu.vector_store %arg5[%c0_24, %c0_25], %33 {strides = array<i32>} : memref<8x128xf32, #tpu.memory_space<vmem>>, vector<8x128xf32>,
      %cst_26 = arith.constant 0.000000e+00 : f32
      %35 = vector.broadcast %cst_26 : f32 to vector<8x128xf32>
      %c0_27 = arith.constant 0 : index
      %c0_28 = arith.constant 0 : index
      %36 = vector.load %arg6[%c0_27, %c0_28] : memref<8x128xf32, #tpu.memory_space<vmem>>, vector<8x128xf32>
      tpu.vector_store %arg6[%c0_27, %c0_28], %35 {strides = array<i32>} : memref<8x128xf32, #tpu.memory_space<vmem>>, vector<8x128xf32>,
      %cst_29 = arith.constant 0.000000e+00 : f32
      %37 = vector.broadcast %cst_29 : f32 to vector<8x128xf32>
      %c0_30 = arith.constant 0 : index
      %c0_31 = arith.constant 0 : index
      %38 = vector.load %arg7[%c0_30, %c0_31] : memref<8x128xf32, #tpu.memory_space<vmem>>, vector<8x128xf32>
      tpu.vector_store %arg7[%c0_30, %c0_31], %37 {strides = array<i32>} : memref<8x128xf32, #tpu.memory_space<vmem>>, vector<8x128xf32>,
    } else {
    }
    %c0 = arith.constant 0 : index
    %3 = memref.load %arg2[%c0] : memref<1xf32, #tpu.memory_space<smem>>
    %c0_1 = arith.constant 0 : index
    %c0_2 = arith.constant 0 : index
    %4 = vector.load %arg3[%c0_1, %c0_2] : memref<16x128xf32, #tpu.memory_space<vmem>>, vector<16x128xf32>
    %c0_3 = arith.constant 0 : index
    %c0_4 = arith.constant 0 : index
    %5 = vector.load %arg4[%c0_3, %c0_4] : memref<16x128xf32, #tpu.memory_space<vmem>>, vector<16x128xf32>
    %6 = arith.subf %4, %5 : vector<16x128xf32>
    %7 = math.absf %6 : vector<16x128xf32>
    %8 = vector.broadcast %3 : f32 to vector<16x128xf32>
    %9 = arith.cmpf ogt, %7, %8 : vector<16x128xf32>
    %cst = arith.constant 0.000000e+00 : f32
    %cst_5 = arith.constant 1.000000e+00 : f32
    %10 = vector.broadcast %cst : f32 to vector<16x128xf32>
    %11 = vector.broadcast %cst_5 : f32 to vector<16x128xf32>
    %12 = arith.select %9, %10, %11 : vector<16x128xi1>, vector<16x128xf32>
    %c0_6 = arith.constant 0 : index
    %c0_7 = arith.constant 0 : index
    %13 = vector.load %arg5[%c0_6, %c0_7] : memref<8x128xf32, #tpu.memory_space<vmem>>, vector<8x128xf32>
    %cst_8 = arith.constant 0.000000e+00 : f32
    %14 = vector.broadcast %cst_8 : f32 to vector<16x128xf32>
    %15 = arith.select %9, %14, %7 : vector<16x128xi1>, vector<16x128xf32>
    %16 = vector.shape_cast %15 : vector<16x128xf32> to vector<2x8x128xf32>
    %cst_9 = arith.constant dense<0.000000e+00> : vector<8x128xf32>
    %17 = vector.multi_reduction <add>, %16, %cst_9 [0] : vector<2x8x128xf32> to vector<8x128xf32>
    %18 = arith.addf %13, %17 : vector<8x128xf32>
    %c0_10 = arith.constant 0 : index
    %c0_11 = arith.constant 0 : index
    %19 = vector.load %arg5[%c0_10, %c0_11] : memref<8x128xf32, #tpu.memory_space<vmem>>, vector<8x128xf32>
    tpu.vector_store %arg5[%c0_10, %c0_11], %18 {strides = array<i32>} : memref<8x128xf32, #tpu.memory_space<vmem>>, vector<8x128xf32>,
    %c0_12 = arith.constant 0 : index
    %c0_13 = arith.constant 0 : index
    %20 = vector.load %arg6[%c0_12, %c0_13] : memref<8x128xf32, #tpu.memory_space<vmem>>, vector<8x128xf32>
    %21 = vector.shape_cast %12 : vector<16x128xf32> to vector<2x8x128xf32>
    %cst_14 = arith.constant dense<0.000000e+00> : vector<8x128xf32>
    %22 = vector.multi_reduction <add>, %21, %cst_14 [0] : vector<2x8x128xf32> to vector<8x128xf32>
    %23 = arith.addf %20, %22 : vector<8x128xf32>
    %c0_15 = arith.constant 0 : index
    %c0_16 = arith.constant 0 : index
    %24 = vector.load %arg6[%c0_15, %c0_16] : memref<8x128xf32, #tpu.memory_space<vmem>>, vector<8x128xf32>
    tpu.vector_store %arg6[%c0_15, %c0_16], %23 {strides = array<i32>} : memref<8x128xf32, #tpu.memory_space<vmem>>, vector<8x128xf32>,
    %c0_17 = arith.constant 0 : index
    %c0_18 = arith.constant 0 : index
    %25 = vector.load %arg7[%c0_17, %c0_18] : memref<8x128xf32, #tpu.memory_space<vmem>>, vector<8x128xf32>
    %26 = arith.mulf %7, %7 : vector<16x128xf32>
    %cst_19 = arith.constant 0.000000e+00 : f32
    %27 = vector.broadcast %cst_19 : f32 to vector<16x128xf32>
    %28 = arith.select %9, %26, %27 : vector<16x128xi1>, vector<16x128xf32>
    %29 = vector.shape_cast %28 : vector<16x128xf32> to vector<2x8x128xf32>
    %cst_20 = arith.constant dense<0.000000e+00> : vector<8x128xf32>
    %30 = vector.multi_reduction <add>, %29, %cst_20 [0] : vector<2x8x128xf32> to vector<8x128xf32>
    %31 = arith.addf %25, %30 : vector<8x128xf32>
    %c0_21 = arith.constant 0 : index
    %c0_22 = arith.constant 0 : index
    %32 = vector.load %arg7[%c0_21, %c0_22] : memref<8x128xf32, #tpu.memory_space<vmem>>, vector<8x128xf32>
    tpu.vector_store %arg7[%c0_21, %c0_22], %31 {strides = array<i32>} : memref<8x128xf32, #tpu.memory_space<vmem>>, vector<8x128xf32>,
    return
  }
  func.func @transform_0(%arg0: i32, %arg1: i32) -> i32 {
    %c0_i32 = arith.constant 0 : i32
    %c0_i32_0 = arith.constant 0 : i32
    return %c0_i32 : i32
  }
  func.func @transform_1(%arg0: i32, %arg1: i32) -> (i32, i32) {
    %c1_i32 = arith.constant 1 : i32
    %0 = arith.muli %arg0, %c1_i32 : i32
    %1 = arith.addi %0, %arg1 : i32
    %c0_i32 = arith.constant 0 : i32
    %c0_i32_0 = arith.constant 0 : i32
    return %1, %c0_i32 : i32, i32
  }
  func.func @transform_2(%arg0: i32, %arg1: i32) -> (i32, i32) {
    %c1_i32 = arith.constant 1 : i32
    %0 = arith.muli %arg0, %c1_i32 : i32
    %1 = arith.addi %0, %arg1 : i32
    %c0_i32 = arith.constant 0 : i32
    %c0_i32_0 = arith.constant 0 : i32
    return %1, %c0_i32 : i32, i32
  }
  func.func @transform_3(%arg0: i32, %arg1: i32) -> (i32, i32) {
    %c0_i32 = arith.constant 0 : i32
    %c0_i32_0 = arith.constant 0 : i32
    return %arg0, %c0_i32 : i32, i32
  }
  func.func @transform_4(%arg0: i32, %arg1: i32) -> (i32, i32) {
    %c0_i32 = arith.constant 0 : i32
    %c0_i32_0 = arith.constant 0 : i32
    return %arg0, %c0_i32 : i32, i32
  }
  func.func @transform_5(%arg0: i32, %arg1: i32) -> (i32, i32) {
    %c0_i32 = arith.constant 0 : i32
    %c0_i32_0 = arith.constant 0 : i32
    return %arg0, %c0_i32 : i32, i32
  }
}

</mosaic_0001>

<bundles_post_ra>
// kernel: _berhu_loss_impl.2
= control target key start
LH: loop header
LB: loop body
LE: loop exit
PB: predicated region body
PF: predicated region fallthrough
CT: control target
= control target key end

     0   :  { %s119_s0 = inlined_call_operand.vmem [shape: f32[16,128], index: 0, kind: input, shape index: {}]   ;;  %s120_s1 = inlined_call_operand.vmem [shape: f32[16,128], index: 1, kind: input, shape index: {}]   ;;  %s121_s2 = inlined_call_operand.vmem [shape: f32[8,128], index: 2, kind: output, shape index: {}]  }
   0x1   :  { %v60_v0 = vld [vmem:[%s119_s0] sm:$0xff]  ;;  %v61_v1 = vld [vmem:[%s119_s0 + $0x8] sm:$0xff] }
   0x2   :  { %v62_v2 = vld [vmem:[%s120_s1] sm:$0xff]  ;;  %v63_v3 = vld [vmem:[%s120_s1 + $0x8] sm:$0xff] }
   0x3   :  { %v64_v4 = vsub.f32 %v60_v0, %v62_v2  ;;  %v65_v5 = vsub.f32 %v61_v1, %v63_v3 }
   0x5   :  { %v66_v6 = vand.u32 2147483647, %v64_v4  ;;  %v67_v7 = vand.u32 2147483647, %v65_v5 }
   0x7   :  { %v69_v8 = vmax.f32.f32 %v66_v6, %v67_v7 }
   0x9   :  { %71 = vst [vmem:[%s121_s2] sm:$0xff] %v69_v8 }

// kernel: _berhu_loss_impl.3
= control target key start
LH: loop header
LB: loop body
LE: loop exit
PB: predicated region body
PF: predicated region fallthrough
CT: control target
= control target key end

     0   :  { %v127_v11 = vmov 1.0   ;;  %s182_s0 = inlined_call_operand.<no memory space> [shape: f32[1], index: 0, kind: input, shape index: {}]   ;;  %s183_s1 = inlined_call_operand.vmem [shape: f32[16,128], index: 1, kind: input, shape index: {}]   ;;  %s184_s2 = inlined_call_operand.vmem [shape: f32[16,128], index: 2, kind: input, shape index: {}]   ;;  %s185_s3 = inlined_call_operand.vmem [shape: f32[8,128], index: 3, kind: output, shape index: {0}]   ;;  %s186_s4 = inlined_call_operand.vmem [shape: f32[8,128], index: 4, kind: output, shape index: {1}]   ;;  %s187_s5 = inlined_call_operand.vmem [shape: f32[8,128], index: 5, kind: output, shape index: {2}]  }
   0x1   :  { %v70_v0 = vld [vmem:[%s183_s1] sm:$0xff]  ;;  %v71_v1 = vld [vmem:[%s183_s1 + $0x8] sm:$0xff]  ;;  %v78_v6 = vstv %s182_s0 }
   0x2   :  { %v72_v2 = vld [vmem:[%s184_s2] sm:$0xff]  ;;  %v73_v3 = vld [vmem:[%s184_s2 + $0x8] sm:$0xff] }
   0x3   :  { %v74_v4 = vsub.f32 %v70_v0, %v72_v2  ;;  %v75_v5 = vsub.f32 %v71_v1, %v73_v3 }
   0x5   :  { %v76_v7 = vand.u32 2147483647, %v74_v4  ;;  %v77_v8 = vand.u32 2147483647, %v75_v5 }
   0x7   :  { %vm79_vm0 = vcmp.gt.f32.partialorder %v76_v7, %v78_v6  ;;  %v94_v9 = vmul.f32 %v76_v7, %v76_v7  ;;  %vm80_vm1 = vcmp.gt.f32.partialorder %v77_v8, %v78_v6  ;;  %v95_v13 = vmul.f32 %v77_v8, %v77_v8 }
   0x8   :  { %v84_v10 = vsel %vm79_vm0, 0.0, %v76_v7  ;;  %v81_v12 = vsel %vm79_vm0, 0.0, %v127_v11  ;;  %v85_v14 = vsel %vm80_vm1, 0.0, %v77_v8  ;;  %v82_v15 = vsel %vm80_vm1, 0.0, %v127_v11 }
   0x9   :  { %v96_v16 = vsel %vm79_vm0, %v94_v9, 0.0  ;;  %v86_v17 = vadd.f32 %v85_v14, %v84_v10  ;;  %v90_v18 = vadd.f32 %v82_v15, %v81_v12  ;;  %v97_v19 = vsel %vm80_vm1, %v95_v13, 0.0 }
   0xa   :  { %v98_v20 = vadd.f32 %v97_v19, %v96_v16 }
   0xb   :  { %88 = vst [vmem:[%s185_s3] sm:$0xff] %v86_v17  ;;  %92 = vst [vmem:[%s186_s4] sm:$0xff] %v90_v18 }
   0xc   :  { %100 = vst [vmem:[%s187_s5] sm:$0xff] %v98_v20 }

</bundles_post_ra>
